<compile_context>
chip_gen: v5e
topology: v5e:2x2
jax: 0.10.0
libtpu: 0.0.40
codegen_flags: <defaults>
</compile_context>

<pallas_src>
import jax
import jax.numpy as jnp
from jax import lax
from jax.experimental import pallas as pl
from jax.experimental.pallas import tpu as pltpu

NZ = 100
BN_EPS = 1e-5


def _round_up(x, m):
    return (x + m - 1) // m * m


# ----------------------------- Pallas kernels ------------------------------

def _make_matmul_kernel(apply_tanh):
    def kernel(a_ref, b_ref, o_ref, acc_ref):
        @pl.when(pl.program_id(2) == 0)
        def _():
            acc_ref[...] = jnp.zeros_like(acc_ref)

        acc_ref[...] += jnp.dot(a_ref[...], b_ref[...],
                                preferred_element_type=jnp.float32)

        @pl.when(pl.program_id(2) == pl.num_programs(2) - 1)
        def _():
            r = acc_ref[...]
            if apply_tanh:
                r = jnp.tanh(r)           # fused epilogue (EUP), lane-dense
            o_ref[...] = r.astype(o_ref.dtype)
    return kernel


def pallas_matmul(a, b, apply_tanh=False):
    """C = A @ B on the MXU; bf16 inputs, fp32 accumulation, shape-aware tiles."""
    M, K = a.shape
    K2, N = b.shape
    assert K == K2
    tm = min(128, _round_up(M, 16))        # bf16 sublane packing -> mult. of 16
    tk = min(1024, _round_up(K, 128))
    tn = min(512, _round_up(N, 128))
    Mp, Kp, Np = _round_up(M, tm), _round_up(K, tk), _round_up(N, tn)

    a = a.astype(jnp.bfloat16)
    b = b.astype(jnp.bfloat16)
    if (Mp, Kp) != (M, K):
        a = jnp.pad(a, ((0, Mp - M), (0, Kp - K)))     # zero-fill ragged edges
    if (Kp, Np) != (K, N):
        b = jnp.pad(b, ((0, Kp - K), (0, Np - N)))

    cost = pl.CostEstimate(
        flops=2 * Mp * Kp * Np,
        transcendentals=Mp * Np if apply_tanh else 0,
        bytes_accessed=2 * (Mp * Kp + Kp * Np) + 4 * Mp * Np)

    out = pl.pallas_call(
        _make_matmul_kernel(apply_tanh),
        out_shape=jax.ShapeDtypeStruct((Mp, Np), jnp.float32),
        grid_spec=pltpu.PrefetchScalarGridSpec(
            num_scalar_prefetch=0,
            grid=(Mp // tm, Np // tn, Kp // tk),
            in_specs=[pl.BlockSpec((tm, tk), lambda i, j, k: (i, k)),
                      pl.BlockSpec((tk, tn), lambda i, j, k: (k, j))],
            out_specs=pl.BlockSpec((tm, tn), lambda i, j, k: (i, j)),
            scratch_shapes=[pltpu.VMEM((tm, tn), jnp.float32)]),
        compiler_params=pltpu.CompilerParams(
            dimension_semantics=("parallel", "parallel", "arbitrary")),
        cost_estimate=cost,
    )(a, b)
    if (Mp, Np) != (M, N):
        out = out[:M, :N]
    return out


def _bn_relu_kernel(x_ref, g_ref, b_ref, o_ref):
    x = x_ref[...]                                   # (R, cb)
    mean = jnp.mean(x, axis=0, keepdims=True)        # batch+spatial stats
    var = jnp.mean(jnp.square(x - mean), axis=0, keepdims=True)  # biased var
    y = (x - mean) * lax.rsqrt(var + BN_EPS)
    o_ref[...] = jnp.maximum(y * g_ref[...] + b_ref[...], 0.0)


def pallas_bn_relu_2d(x2d, gamma, beta):
    """Training-mode BatchNorm(batch stats) + ReLU, tiled over channel blocks."""
    R, C = x2d.shape
    cb = min(C, 128)
    assert C % cb == 0
    return pl.pallas_call(
        _bn_relu_kernel,
        out_shape=jax.ShapeDtypeStruct((R, C), jnp.float32),
        grid=(C // cb,),
        in_specs=[pl.BlockSpec((R, cb), lambda j: (0, j)),
                  pl.BlockSpec((1, cb), lambda j: (0, j)),
                  pl.BlockSpec((1, cb), lambda j: (0, j))],
        out_specs=pl.BlockSpec((R, cb), lambda j: (0, j)),
        compiler_params=pltpu.CompilerParams(dimension_semantics=("parallel",)),
    )(x2d, gamma.reshape(1, C), beta.reshape(1, C))


# --------------------------- layer-level wrappers ---------------------------

def conv_transpose_first(x_nc, w):
    """ConvTranspose2d(nz, Cout, k=4, s=1, p=0) on 1x1 input == plain matmul.
    x_nc: [N, Cin];  w: [Cin, Cout, 4, 4]  ->  [N, 4, 4, Cout]
    """
    N, Cin = x_nc.shape
    Cout = w.shape[1]
    wm = jnp.transpose(w, (0, 2, 3, 1)).reshape(Cin, 16 * Cout)
    return pallas_matmul(x_nc, wm).reshape(N, 4, 4, Cout)


def _subpixel_weight(w):
    """ConvTranspose2d weight [Cin, Cout, 4, 4] -> sub-pixel matrix [4*Cin, 4*Cout].
    Rows = (dh, dw, ci) taps of a 2x2 input window, cols = (ph, pw, co) output
    phases; tap (dh,dw) of phase (ph,pw) uses kernel element (3-ph-2dh, 3-pw-2dw).
    """
    rows = []
    for dh in range(2):
        for dw in range(2):
            cols = []
            for ph in range(2):
                for pw in range(2):
                    cols.append(w[:, :, 3 - ph - 2 * dh, 3 - pw - 2 * dw])
            rows.append(jnp.concatenate(cols, axis=1))   # [Cin, 4*Cout]
    return jnp.concatenate(rows, axis=0)                 # [4*Cin, 4*Cout]


def conv_transpose_s2(x_nhwc, w, apply_tanh=False):
    """ConvTranspose2d(Cin, Cout, k=4, s=2, p=1, bias=False), sub-pixel form.

    Each output pixel of phase (oh%2, ow%2) depends on exactly one 2x2 window
    of the 1-padded input, so the whole deconv is ONE matmul with K = 4*Cin
    followed by a static phase interleave (no dilation zeros on the MXU).
    x_nhwc: [N, H, W, Cin];  w: [Cin, Cout, 4, 4]  ->  [N, 2H, 2W, Cout]
    """
    N, H, W, Cin = x_nhwc.shape
    Cout = w.shape[1]
    xp = jnp.pad(x_nhwc, ((0, 0), (1, 1), (1, 1), (0, 0)))      # [N,H+2,W+2,Cin]
    # all 2x2 windows of the padded input, stride 1: (H+1) x (W+1) of them
    pats = [xp[:, dh:dh + H + 1, dw:dw + W + 1, :]
            for dh in range(2) for dw in range(2)]
    patches = jnp.concatenate(pats, axis=-1)                    # [N,H+1,W+1,4*Cin]
    a = patches.reshape(N * (H + 1) * (W + 1), 4 * Cin)
    bmat = _subpixel_weight(w)                                  # [4*Cin, 4*Cout]
    out = pallas_matmul(a, bmat, apply_tanh=apply_tanh)
    out = out.reshape(N, H + 1, W + 1, 2, 2, Cout)              # [n,r,c,ph,pw,co]
    # out[n, 2m+ph, 2k+pw, co] == out6[n, m+ph, k+pw, ph, pw, co]
    phase_rows = []
    for ph in range(2):
        phase_cols = [out[:, ph:ph + H, pw:pw + W, ph, pw, :] for pw in range(2)]
        phase_rows.append(jnp.stack(phase_cols, axis=3))        # [N,H,W,2,Cout]
    y = jnp.stack(phase_rows, axis=2)                           # [N,H,2,W,2,Cout]
    return y.reshape(N, 2 * H, 2 * W, Cout)


def bn_relu(x_nhwc, gamma, beta):
    N, H, W, C = x_nhwc.shape
    y = pallas_bn_relu_2d(x_nhwc.reshape(N * H * W, C), gamma, beta)
    return y.reshape(N, H, W, C)


# ------------------------------ full generator ------------------------------

def init_params(key):
    ks = jax.random.split(key, 5)
    std = 0.02  # DCGAN-style init; BN: weight=1, bias=0 (PyTorch defaults)
    return {
        "w1": std * jax.random.normal(ks[0], (NZ, 512, 4, 4), jnp.float32),
        "g1": jnp.ones((512,), jnp.float32), "b1": jnp.zeros((512,), jnp.float32),
        "w2": std * jax.random.normal(ks[1], (512, 256, 4, 4), jnp.float32),
        "g2": jnp.ones((256,), jnp.float32), "b2": jnp.zeros((256,), jnp.float32),
        "w3": std * jax.random.normal(ks[2], (256, 128, 4, 4), jnp.float32),
        "g3": jnp.ones((128,), jnp.float32), "b3": jnp.zeros((128,), jnp.float32),
        "w4": std * jax.random.normal(ks[3], (128, 64, 4, 4), jnp.float32),
        "g4": jnp.ones((64,), jnp.float32), "b4": jnp.zeros((64,), jnp.float32),
        "w5": std * jax.random.normal(ks[4], (64, 3, 4, 4), jnp.float32),
    }


def generator_forward(x_nchw, params):
    """x_nchw: [N, nz, 1, 1]  ->  [N, 3, 64, 64] (tanh output)."""
    # TODO(synk): BatchNorm uses batch statistics (training mode); eval-mode
    # running stats are not modeled (matches previous version's semantics).
    N = x_nchw.shape[0]
    x = x_nchw.reshape(N, NZ)                               # 1x1 spatial
    h = conv_transpose_first(x, params["w1"])               # [N, 4, 4, 512]
    h = bn_relu(h, params["g1"], params["b1"])
    h = conv_transpose_s2(h, params["w2"])                  # [N, 8, 8, 256]
    h = bn_relu(h, params["g2"], params["b2"])
    h = conv_transpose_s2(h, params["w3"])                  # [N, 16, 16, 128]
    h = bn_relu(h, params["g3"], params["b3"])
    h = conv_transpose_s2(h, params["w4"])                  # [N, 32, 32, 64]
    h = bn_relu(h, params["g4"], params["b4"])
    h = conv_transpose_s2(h, params["w5"], apply_tanh=True) # [N, 64, 64, 3] + tanh
    return jnp.transpose(h, (0, 3, 1, 2))                   # back to NCHW


# ------------------------------- references ---------------------------------

def _deconv_s2_ref(x_nhwc, w):
    """fp32 XLA reference for PyTorch ConvTranspose2d(k=4, s=2, p=1, bias=False)."""
    wf = jnp.transpose(w[:, :, ::-1, ::-1], (2, 3, 0, 1))   # [kh, kw, Cin, Cout]
    return lax.conv_general_dilated(
        x_nhwc, wf, window_strides=(1, 1), padding=[(2, 2), (2, 2)],
        lhs_dilation=(2, 2), dimension_numbers=("NHWC", "HWIO", "NHWC"))


if __name__ == "__main__":
    key = jax.random.PRNGKey(0)
    k_param, k_x, k_a, k_b, k_cx, k_cw = jax.random.split(key, 6)

    # 1) Pallas matmul vs bf16 XLA dot on a ragged shape.
    a = jax.random.normal(k_a, (37, 211), jnp.float32)
    b = jax.random.normal(k_b, (211, 67), jnp.float32)
    got = jax.block_until_ready(pallas_matmul(a, b))
    ref = jnp.dot(a.astype(jnp.bfloat16), b.astype(jnp.bfloat16),
                  preferred_element_type=jnp.float32)
    assert jnp.allclose(got, ref, atol=2e-2, rtol=2e-2), "matmul mismatch"

    # 2) Sub-pixel deconv vs XLA dilated-conv reference (bf16-level tolerance).
    cx = jax.random.normal(k_cx, (2, 5, 3, 16), jnp.float32)
    cw = 0.05 * jax.random.normal(k_cw, (16, 8, 4, 4), jnp.float32)
    got_c = jax.block_until_ready(conv_transpose_s2(cx, cw))
    ref_c = _deconv_s2_ref(cx, cw)
    assert got_c.shape == ref_c.shape, (got_c.shape, ref_c.shape)
    assert jnp.allclose(got_c, ref_c, atol=1e-2, rtol=5e-2), "deconv mismatch"

    # 3) Full generator forward (batch=2 latent).
    params = init_params(k_param)
    x = jax.random.normal(k_x, (2, NZ, 1, 1), jnp.float32)
    fwd = jax.jit(generator_forward)
    out = jax.block_until_ready(fwd(x, params))

    assert out.shape == (2, 3, 64, 64), out.shape
    assert out.dtype == jnp.float32
    assert bool(jnp.all(jnp.isfinite(out)))
    assert bool(jnp.all(jnp.abs(out) <= 1.0 + 1e-6))  # tanh range
    print("KERNEL_OK")
</pallas_src>

<mosaic_0001>
module attributes {stable_mosaic.version = 11 : i64} {
  func.func @kernel(%arg0: i32, %arg1: i32, %arg2: i32, %arg3: memref<48x256xbf16, #tpu.memory_space<vmem>>, %arg4: memref<256x128xbf16, #tpu.memory_space<vmem>>, %arg5: memref<48x128xf32, #tpu.memory_space<vmem>>, %arg6: memref<48x128xf32, #tpu.memory_space<vmem>>) attributes {dimension_semantics = [#tpu.dimension_semantics<parallel>, #tpu.dimension_semantics<parallel>, #tpu.dimension_semantics<arbitrary>], iteration_bounds = array<i64: 1, 1, 1>, scalar_prefetch = 0 : i64, scratch_operands = 1 : i64, tpu.core_type = #tpu.core_type<tc>, window_params = [{transform_indices = @transform_0, window_bounds = array<i64: 48, 256>}, {transform_indices = @transform_1, window_bounds = array<i64: 256, 128>}, {transform_indices = @transform_2, window_bounds = array<i64: 48, 128>}]} {
    %c0_i32 = arith.constant 0 : i32
    %0 = arith.cmpi eq, %arg2, %c0_i32 : i32
    %1 = arith.extui %0 : i1 to i32
    %c0_i32_0 = arith.constant 0 : i32
    %2 = arith.cmpi ne, %1, %c0_i32_0 : i32
    scf.if %2 {
      %cst_10 = arith.constant 0.000000e+00 : f32
      %12 = vector.broadcast %cst_10 : f32 to vector<48x128xf32>
      %c0_11 = arith.constant 0 : index
      %c0_12 = arith.constant 0 : index
      %13 = vector.load %arg6[%c0_11, %c0_12] : memref<48x128xf32, #tpu.memory_space<vmem>>, vector<48x128xf32>
      tpu.vector_store %arg6[%c0_11, %c0_12], %12 {strides = array<i32>} : memref<48x128xf32, #tpu.memory_space<vmem>>, vector<48x128xf32>,
    } else {
    }
    %c0 = arith.constant 0 : index
    %c0_1 = arith.constant 0 : index
    %3 = vector.load %arg6[%c0, %c0_1] : memref<48x128xf32, #tpu.memory_space<vmem>>, vector<48x128xf32>
    %c0_2 = arith.constant 0 : index
    %c0_3 = arith.constant 0 : index
    %4 = vector.load %arg3[%c0_2, %c0_3] : memref<48x256xbf16, #tpu.memory_space<vmem>>, vector<48x256xbf16>
    %c0_4 = arith.constant 0 : index
    %c0_5 = arith.constant 0 : index
    %5 = vector.load %arg4[%c0_4, %c0_5] : memref<256x128xbf16, #tpu.memory_space<vmem>>, vector<256x128xbf16>
    %cst = arith.constant dense<0.000000e+00> : vector<48x128xf32>
    %6 = tpu.matmul %4, %5, %cst {dimension_numbers = #tpu.dot_dimension_numbers<[1], [0], [0], [1], [0, 0, 1, 1], [], []>} : vector<48x256xbf16>, vector<256x128xbf16>, vector<48x128xf32> -> vector<48x128xf32>
    %7 = arith.addf %3, %6 : vector<48x128xf32>
    %c0_6 = arith.constant 0 : index
    %c0_7 = arith.constant 0 : index
    %8 = vector.load %arg6[%c0_6, %c0_7] : memref<48x128xf32, #tpu.memory_space<vmem>>, vector<48x128xf32>
    tpu.vector_store %arg6[%c0_6, %c0_7], %7 {strides = array<i32>} : memref<48x128xf32, #tpu.memory_space<vmem>>, vector<48x128xf32>,
    %c0_i32_8 = arith.constant 0 : i32
    %9 = arith.cmpi eq, %arg2, %c0_i32_8 : i32
    %10 = arith.extui %9 : i1 to i32
    %c0_i32_9 = arith.constant 0 : i32
    %11 = arith.cmpi ne, %10, %c0_i32_9 : i32
    scf.if %11 {
      %c0_10 = arith.constant 0 : index
      %c0_11 = arith.constant 0 : index
      %12 = vector.load %arg6[%c0_10, %c0_11] : memref<48x128xf32, #tpu.memory_space<vmem>>, vector<48x128xf32>
      %c0_12 = arith.constant 0 : index
      %c0_13 = arith.constant 0 : index
      %13 = vector.load %arg5[%c0_12, %c0_13] : memref<48x128xf32, #tpu.memory_space<vmem>>, vector<48x128xf32>
      tpu.vector_store %arg5[%c0_12, %c0_13], %12 {strides = array<i32>} : memref<48x128xf32, #tpu.memory_space<vmem>>, vector<48x128xf32>,
    } else {
    }
    return
  }
  func.func @transform_0(%arg0: i32, %arg1: i32, %arg2: i32) -> (i32, i32) {
    %c0_i32 = arith.constant 0 : i32
    return %arg0, %arg2 : i32, i32
  }
  func.func @transform_1(%arg0: i32, %arg1: i32, %arg2: i32) -> (i32, i32) {
    %c0_i32 = arith.constant 0 : i32
    return %arg2, %arg1 : i32, i32
  }
  func.func @transform_2(%arg0: i32, %arg1: i32, %arg2: i32) -> (i32, i32) {
    %c0_i32 = arith.constant 0 : i32
    return %arg0, %arg1 : i32, i32
  }
}

</mosaic_0001>

<bundles_post_ra>
// kernel: tpu_custom_call.1
= control target key start
LH: loop header
LB: loop body
LE: loop exit
PB: predicated region body
PF: predicated region fallthrough
CT: control target
= control target key end

     0   :  { %7 = vsyncpa [#allocation4], 0  ;;  %s567_s0 = inlined_call_operand.hbm [shape: bf16[48,256], index: 0, kind: input, shape index: {}]   ;;  %s568_s1 = inlined_call_operand.hbm [shape: bf16[256,128], index: 1, kind: input, shape index: {}]   ;;  %s569_s2 = inlined_call_operand.hbm [shape: f32[48,128], index: 2, kind: output, shape index: {}]  }
   0x1   :  { %8 = vsyncpa [#allocation7], 0 }
   0x2   :  { %9 = vsyncpa [#allocation5], 0  ;;  %s14_s11 = sshll.u32 %s567_s0, 4  ;;  %s530_s12 = smov [#allocation3]   ;;  %s15_s11 = int_to_ptr.hbm [resolvable:$true] %s14_s11 }
   0x3   :  { %s16_s13 = sshll.u32 %s530_s12, 4  ;;  %s27_s16 = sshll.u32 %s568_s1, 4  ;;  %s17_s13 = int_to_ptr.vmem [resolvable:$true] %s16_s13  ;;  %s28_s16 = int_to_ptr.hbm [resolvable:$true] %s27_s16 }
   0x4   :  { %s531_s17 = smov 128   ;;  %s532_s18 = smov 8  }
   0x5   :  { %22 = dma.hbm_to_vmem [thread:$0]  %s15_s11, 768, %s17_s13, [#allocation4], %s531_s17, %s531_s17, %s532_s18  }
   0x6   :  { %s533_s19 = smov [#allocation6]   ;;  %s534_s21 = smov 64  }
   0x7   :  { %s29_s20 = sshll.u32 %s533_s19, 4  ;;  %s535_s0 = smov 4   ;;  %s30_s20 = int_to_ptr.vmem [resolvable:$true] %s29_s20 }
   0x8   :  { %35 = dma.hbm_to_vmem [thread:$0]  %s28_s16, 2048, %s30_s20, [#allocation7], %s534_s21, %s534_s21, %s535_s0  }
   0x9   :  { %524 = dma.done.wait [#allocation4], 768  }
   0xa   :  { %525 = vsyncadd [#allocation4], 4294966528 }
   0xb   :  { %526 = dma.done.wait [#allocation7], 2048  }
   0xc   :  { %527 = vsyncadd [#allocation7], 4294965248  ;;  %v420_v0 = vld [vmem:[#allocation6 + $0x38] sm:$0xff]  ;;  %v419_v2 = vld [vmem:[#allocation6 + $0x30] sm:$0xff]  ;;  %s536_s1 = smov [#allocation8]   ;;  %s305_s25 = sshll.u32 %s569_s2, 4  ;;  %s306_s25 = int_to_ptr.hbm [resolvable:$true] %s305_s25 }
   0xd   :  { %v428_v1 = vld [vmem:[#allocation6 + $0x78] sm:$0xff]  ;;  %429 = vmatpush.bf16.msra.mxu2 %v420_v0  ;;  %v427_v3 = vld [vmem:[#allocation6 + $0x70] sm:$0xff]  ;;  %224 = vmatpush.bf16.msra.mxu0 %v420_v0  ;;  %v418_v4 = vld [vmem:[#allocation6 + $0x28] sm:$0xff]  ;;  %s303_s22 = sshll.u32 %s536_s1, 4  ;;  %s304_s22 = int_to_ptr.vmem [resolvable:$true] %s303_s22 }
   0xe   :  { %437 = vmatpush.bf16.msra.mxu3 %v428_v1  ;;  %248 = vmatpush.bf16.msra.mxu1 %v428_v1  ;;  %v426_v5 = vld [vmem:[#allocation6 + $0x68] sm:$0xff]  ;;  %v417_v6 = vld [vmem:[#allocation6 + $0x20] sm:$0xff]  ;;  %v416_v8 = vld [vmem:[#allocation6 + $0x18] sm:$0xff] }
   0xf   :  { %v425_v7 = vld [vmem:[#allocation6 + $0x60] sm:$0xff]  ;;  %v424_v9 = vld [vmem:[#allocation6 + $0x58] sm:$0xff]  ;;  %v415_v10 = vld [vmem:[#allocation6 + $0x10] sm:$0xff] }
  0x10   :  { %v423_v11 = vld [vmem:[#allocation6 + $0x50] sm:$0xff]  ;;  %v414_v12 = vld [vmem:[#allocation6 + $0x8] sm:$0xff]  ;;  %v413_v14 = vld [vmem:[#allocation6] sm:$0xff] }
  0x11   :  { %430 = vmatpush.bf16.msra.mxu2 %v419_v2  ;;  %225 = vmatpush.bf16.msra.mxu0 %v419_v2  ;;  %v422_v13 = vld [vmem:[#allocation6 + $0x48] sm:$0xff]  ;;  %v421_v15 = vld [vmem:[#allocation6 + $0x40] sm:$0xff]  ;;  %v321_v20 = vld [vmem:[#allocation3] sm:$0xf] }
  0x12   :  { %438 = vmatpush.bf16.msra.mxu3 %v427_v3  ;;  %249 = vmatpush.bf16.msra.mxu1 %v427_v3  ;;  %v329_v16 = vld [vmem:[#allocation3 + $0x10] sm:$0xf]  ;;  %v410_v17 = vld [vmem:[#allocation3 + $0x14] sm:$0xf0]  ;;  %v409_v18 = vld [vmem:[#allocation3 + $0x14] sm:$0xf] }
  0x13   :  { %v331_v19 = vld [vmem:[#allocation3 + $0x18] sm:$0xf0]  ;;  %v408_v21 = vld [vmem:[#allocation3 + $0x4] sm:$0xf0]  ;;  %v407_v22 = vld [vmem:[#allocation3 + $0x4] sm:$0xf]  ;;  %v330_v24 = vor.u32 %v410_v17, %v329_v16 }
  0x14   :  { %v323_v23 = vld [vmem:[#allocation3 + $0x8] sm:$0xf0]  ;;  %v334_v25 = vor.u32 %v409_v18, %v331_v19  ;;  %v322_v26 = vor.u32 %v408_v21, %v321_v20  ;;  %v337_v28 = vld [vmem:[#allocation3 + $0x20] sm:$0xf]  ;;  %v412_v29 = vld [vmem:[#allocation3 + $0x24] sm:$0xf0] }
  0x15   :  { %431 = vmatpush.bf16.msra.mxu2 %v418_v4  ;;  %226 = vmatpush.bf16.msra.mxu0 %v418_v4  ;;  %v326_v27 = vor.u32 %v407_v22, %v323_v23  ;;  %v411_v30 = vld [vmem:[#allocation3 + $0x24] sm:$0xf]  ;;  %v339_v31 = vld [vmem:[#allocation3 + $0x28] sm:$0xf0]  ;;  %v338_v32 = vor.u32 %v412_v29, %v337_v28 }
  0x16   :  { %439 = vmatpush.bf16.msra.mxu3 %v426_v5  ;;  %250 = vmatpush.bf16.msra.mxu1 %v426_v5  ;;  %v342_v33 = vor.u32 %v411_v30, %v339_v31 }
  0x19   :  { %432 = vmatpush.bf16.msra.mxu2 %v417_v6  ;;  %227 = vmatpush.bf16.msra.mxu0 %v417_v6 }
  0x1a   :  { %440 = vmatpush.bf16.msra.mxu3 %v425_v7  ;;  %251 = vmatpush.bf16.msra.mxu1 %v425_v7 }
  0x1d   :  { %433 = vmatpush.bf16.msra.mxu2 %v416_v8  ;;  %228 = vmatpush.bf16.msra.mxu0 %v416_v8 }
  0x1e   :  { %441 = vmatpush.bf16.msra.mxu3 %v424_v9  ;;  %252 = vmatpush.bf16.msra.mxu1 %v424_v9 }
  0x21   :  { %434 = vmatpush.bf16.msra.mxu2 %v415_v10  ;;  %229 = vmatpush.bf16.msra.mxu0 %v415_v10 }
  0x22   :  { %442 = vmatpush.bf16.msra.mxu3 %v423_v11  ;;  %253 = vmatpush.bf16.msra.mxu1 %v423_v11 }
  0x25   :  { %435 = vmatpush.bf16.msra.mxu2 %v414_v12  ;;  %230 = vmatpush.bf16.msra.mxu0 %v414_v12 }
  0x26   :  { %443 = vmatpush.bf16.msra.mxu3 %v422_v13  ;;  %254 = vmatpush.bf16.msra.mxu1 %v422_v13 }
  0x29   :  { %436 = vmatpush.bf16.msra.mxu2 %v413_v14  ;;  %231 = vmatpush.bf16.msra.mxu0 %v413_v14 }
  0x2a   :  { %444 = vmatpush.bf16.msra.mxu3 %v421_v15  ;;  %255 = vmatpush.bf16.msra.mxu1 %v421_v15 }
  0x2c   :  { %237 = vmatmul.bf16.vlgmr.msra.gmra.mxu2 %v330_v24  ;;  %232 = vmatmul.bf16.vlgmr.msra.gmra.mxu0 %v322_v26 }
  0x2d   :  { %261 = vmatmul.bf16.vlgmr.msra.gmra.mxu3 %v334_v25  ;;  %256 = vmatmul.bf16.vlgmr.msra.gmra.mxu1 %v326_v27 }
  0x3c   :  { %242 = vmatmul.bf16.gmra.mxu2 %v338_v32 }
  0x3d   :  { %266 = vmatmul.bf16.gmra.mxu3 %v342_v33 }
  0xa9   :  { %v233_v34 = vpop.f32.mrf.mxu0 }
  0xaa   :  { %v257_v35 = vpop.f32.mrf.mxu1 }
  0xab   :  { %v258_v36 = vadd.f32 %v257_v35, %v233_v34 }
  0xad   :  { %293 = vst [vmem:[#allocation8] sm:$0xff] %v258_v36 }
  0xaf   :  { %v238_v37 = vpop.f32.mrf.mxu2 }
  0xb0   :  { %v262_v38 = vpop.f32.mrf.mxu3 }
  0xb1   :  { %v263_v39 = vadd.f32 %v262_v38, %v238_v37  ;;  %v235_v40 = vpop.f32.mrf.mxu0 }
  0xb2   :  { %v259_v41 = vpop.f32.mrf.mxu1 }
  0xb3   :  { %295 = vst [vmem:[#allocation8 + $0x10] sm:$0xff] %v263_v39  ;;  %v260_v42 = vadd.f32 %v259_v41, %v235_v40 }
  0xb5   :  { %294 = vst [vmem:[#allocation8 + $0x8] sm:$0xff] %v260_v42 }
  0xb7   :  { %v240_v43 = vpop.f32.mrf.mxu2 }
  0xb8   :  { %v264_v44 = vpop.f32.mrf.mxu3 }
  0xb9   :  { %v265_v45 = vadd.f32 %v264_v44, %v240_v43 }
  0xbb   :  { %296 = vst [vmem:[#allocation8 + $0x18] sm:$0xff] %v265_v45 }
  0xbf   :  { %v243_v46 = vpop.f32.mrf.mxu2 }
  0xc0   :  { %v267_v47 = vpop.f32.mrf.mxu3 }
  0xc1   :  { %v268_v48 = vadd.f32 %v267_v47, %v243_v46 }
  0xc3   :  { %297 = vst [vmem:[#allocation8 + $0x20] sm:$0xff] %v268_v48 }
  0xc7   :  { %v245_v49 = vpop.f32.mrf.mxu2 }
  0xc8   :  { %v269_v50 = vpop.f32.mrf.mxu3 }
  0xc9   :  { %v270_v51 = vadd.f32 %v269_v50, %v245_v49 }
  0xcb   :  { %298 = vst [vmem:[#allocation8 + $0x28] sm:$0xff] %v270_v51 }
  0xcc   :  { %311 = dma.vmem_to_hbm [thread:$0]  %s304_s22, 768, %s306_s25, [#allocation5], %s531_s17, %s531_s17, %s532_s18  }
  0xcd   :  { %528 = dma.done.wait [#allocation5], 768  }
  0xce   :  { %529 = vsyncadd [#allocation5], 4294966528 }
  0xcf   :  { %316 = vsyncpa [#allocation4], 1 }
  0xd0   :  { %317 = vsyncpa [#allocation7], 1 }
  0xd1   :  { %318 = vsyncpa [#allocation5], 1 }

</bundles_post_ra>
